<compile_context>
chip_gen: v7x
topology: tpu7x:2x2x1
jax: 0.10.0
libtpu: 0.0.40
codegen_flags: <defaults>
</compile_context>

<pallas_src>
import functools

import jax
import jax.numpy as jnp
from jax import lax
from jax.experimental import pallas as pl
from jax.experimental.pallas import tpu as pltpu

_LANE = 128
_SUBLANE = 8
_BN_EPS = 1e-5
_MM_DTYPE = jnp.bfloat16           # MXU operand dtype (f32 accumulation)
_VMEM_LIMIT = 48 * 1024 * 1024     # bytes; fits v5e/v6e/v7x


def _round_up(a, b):
    return (a + b - 1) // b * b


def _fwd_stats_kernel(x_ref, w1_ref, b1_ref, w2_ref, b2_ref,
                      y_ref, sum_ref, ssq_ref, *, tm, n_rows):
    """y = relu(fc2(relu(fc1 x))) for one row tile + per-tile BN partial sums."""
    x = x_ref[...].astype(w1_ref.dtype)                       # bf16 MXU operand
    h = jnp.dot(x, w1_ref[...], preferred_element_type=jnp.float32) + b1_ref[...]
    h = jnp.maximum(h, 0.0)
    # dropout p=0.0 -> identity
    y = jnp.dot(h.astype(w2_ref.dtype), w2_ref[...],
                preferred_element_type=jnp.float32) + b2_ref[...]
    y = jnp.maximum(y, 0.0)
    y_ref[...] = y.astype(y_ref.dtype)

    # One-pass BatchNorm partial statistics; padded rows masked out so the
    # global mean/var stay exactly over the real N rows.
    if n_rows % tm != 0:
        row = pl.program_id(0) * tm + lax.broadcasted_iota(jnp.int32, (tm, 1), 0)
        y_stat = jnp.where(row < n_rows, y, 0.0)
    else:
        y_stat = y
    part_sum = jnp.sum(y_stat, axis=0, keepdims=True)          # (1, Op)
    part_ssq = jnp.sum(y_stat * y_stat, axis=0, keepdims=True)  # (1, Op)
    sum_ref[...] = part_sum.reshape(sum_ref.shape)
    ssq_ref[...] = part_ssq.reshape(ssq_ref.shape)


def _norm_kernel(y_ref, scale_ref, shift_ref, o_ref):
    """Fused BatchNorm affine: out = y * scale + shift (scale/shift precomputed)."""
    o_ref[...] = (y_ref[...] * scale_ref[...] + shift_ref[...]).astype(o_ref.dtype)


def mlp_forward(inputs, w1, b1, w2, b2, gamma, beta, *, tile_rows=512):
    """inputs: (..., input_dim); weights stored as (in_dim, out_dim)."""
    orig_shape = inputs.shape
    D = orig_shape[-1]
    H = w1.shape[1]
    O = w2.shape[1]
    x = inputs.reshape(-1, D)
    N = x.shape[0]

    # ----- lane-dense, tile-aligned layouts -----
    Dp = _round_up(D, _LANE)
    Hp = _round_up(H, _LANE)
    Op = _round_up(O, _LANE)
    tm = min(tile_rows, _round_up(max(N, 1), _SUBLANE))
    n_pad = _round_up(max(N, 1), tm)
    n_tiles = n_pad // tm

    xp = jnp.pad(x, ((0, n_pad - N), (0, Dp - D))).astype(jnp.float32)
    w1p = jnp.pad(w1, ((0, Dp - D), (0, Hp - H))).astype(_MM_DTYPE)
    w2p = jnp.pad(w2, ((0, Hp - H), (0, Op - O))).astype(_MM_DTYPE)
    b1p = jnp.pad(b1.reshape(1, H), ((0, 0), (0, Hp - H))).astype(jnp.float32)
    b2p = jnp.pad(b2.reshape(1, O), ((0, 0), (0, Op - O))).astype(jnp.float32)

    row_in_spec = pl.BlockSpec((tm, Dp), lambda i: (i, 0))
    row_out_spec = pl.BlockSpec((tm, Op), lambda i: (i, 0))
    const_spec = lambda shape: pl.BlockSpec(shape, lambda i: (0, 0))  # resident
    stat_spec = pl.BlockSpec((1, 1, Op), lambda i: (i, 0, 0))

    cparams = pltpu.CompilerParams(dimension_semantics=("parallel",),
                                   vmem_limit_bytes=_VMEM_LIMIT)
    flops = 2 * n_pad * (Dp * Hp + Hp * Op)
    bytes_accessed = (xp.size * 4 + w1p.size * 2 + w2p.size * 2
                      + (b1p.size + b2p.size) * 4
                      + n_pad * Op * 4 + 2 * n_tiles * Op * 4)

    # Phase 1: fused fc1+relu+fc2+relu per tile, plus per-tile BN partial sums.
    y, tsum, tssq = pl.pallas_call(
        functools.partial(_fwd_stats_kernel, tm=tm, n_rows=N),
        out_shape=(jax.ShapeDtypeStruct((n_pad, Op), jnp.float32),
                   jax.ShapeDtypeStruct((n_tiles, 1, Op), jnp.float32),
                   jax.ShapeDtypeStruct((n_tiles, 1, Op), jnp.float32)),
        grid=(n_tiles,),
        in_specs=[row_in_spec, const_spec((Dp, Hp)), const_spec((1, Hp)),
                  const_spec((Hp, Op)), const_spec((1, Op))],
        out_specs=(row_out_spec, stat_spec, stat_spec),
        compiler_params=cparams,
        cost_estimate=pl.CostEstimate(flops=flops, transcendentals=0,
                                      bytes_accessed=bytes_accessed),
    )(xp, w1p, b1p, w2p, b2p)

    # BatchNorm1d is skipped for single-row / empty batches (PyTorch numel check).
    if N <= 1:
        return y[:N, :O].reshape(orig_shape[:-1] + (O,))

    # Tiny global reduction -> fused affine coefficients (plain JAX, n_tiles x O).
    s1 = jnp.sum(tsum[:, 0, :], axis=0)
    s2 = jnp.sum(tssq[:, 0, :], axis=0)
    mean = s1 / N
    var = jnp.maximum(s2 / N - mean * mean, 0.0)   # biased (training-mode) variance
    gammap = jnp.pad(gamma, (0, Op - O)).astype(jnp.float32)
    betap = jnp.pad(beta, (0, Op - O)).astype(jnp.float32)
    scale = (gammap * lax.rsqrt(var + _BN_EPS)).reshape(1, Op)
    shift = (betap - mean * scale[0]).reshape(1, Op)

    # Phase 2: apply the global BatchNorm affine per tile (lane-dense stores).
    out = pl.pallas_call(
        _norm_kernel,
        out_shape=jax.ShapeDtypeStruct((n_pad, Op), jnp.float32),
        grid=(n_tiles,),
        in_specs=[row_out_spec, const_spec((1, Op)), const_spec((1, Op))],
        out_specs=row_out_spec,
        compiler_params=cparams,
    )(y, scale, shift)

    return out[:N, :O].reshape(orig_shape[:-1] + (O,))


def init_params(key, input_dim, hidden_dim, output_dim):
    """Matches MLP.init_weights(): xavier_normal_ weights, bias=0.1, BN gamma=1 beta=0."""
    k1, k2 = jax.random.split(key)
    std1 = (2.0 / (input_dim + hidden_dim)) ** 0.5
    std2 = (2.0 / (hidden_dim + output_dim)) ** 0.5
    # stored as (in_dim, out_dim); equivalent to PyTorch weight.T
    w1 = std1 * jax.random.normal(k1, (input_dim, hidden_dim), jnp.float32)
    w2 = std2 * jax.random.normal(k2, (hidden_dim, output_dim), jnp.float32)
    b1 = jnp.full((hidden_dim,), 0.1, jnp.float32)
    b2 = jnp.full((output_dim,), 0.1, jnp.float32)
    gamma = jnp.ones((output_dim,), jnp.float32)
    beta = jnp.zeros((output_dim,), jnp.float32)
    return w1, b1, w2, b2, gamma, beta


def _reference(x, w1, b1, w2, b2, gamma, beta):
    """Pure-JAX reference using the same bf16-operand / f32-accumulate matmuls."""
    xf = x.reshape(-1, x.shape[-1])
    h = jnp.dot(xf.astype(_MM_DTYPE), w1.astype(_MM_DTYPE),
                preferred_element_type=jnp.float32) + b1
    h = jnp.maximum(h, 0.0)
    y = jnp.dot(h.astype(_MM_DTYPE), w2.astype(_MM_DTYPE),
                preferred_element_type=jnp.float32) + b2
    y = jnp.maximum(y, 0.0)
    if y.shape[0] > 1:
        mean = jnp.mean(y, axis=0, keepdims=True)
        var = jnp.mean((y - mean) ** 2, axis=0, keepdims=True)
        y = (y - mean) / jnp.sqrt(var + _BN_EPS) * gamma + beta
    return y.reshape(x.shape[:-1] + (w2.shape[1],))


if __name__ == "__main__":
    input_dim, hidden_dim, output_dim = 16, 32, 32
    key = jax.random.PRNGKey(0)
    kx, kx2, kp = jax.random.split(key, 3)
    params = init_params(kp, input_dim, hidden_dim, output_dim)

    fwd = jax.jit(mlp_forward)

    # Case 1: (B, S, D) = (2, 8, 16) -> N = 16 rows for BatchNorm1d
    inputs = jax.random.normal(kx, (2, 8, input_dim), jnp.float32)
    out = jax.block_until_ready(fwd(inputs, *params))
    ref = _reference(inputs, *params)
    assert out.shape == (2, 8, output_dim), out.shape
    assert jnp.allclose(out, ref, atol=2e-3, rtol=2e-3), \
        float(jnp.max(jnp.abs(out - ref)))

    # Case 2: ragged row count (exercises row padding + masked statistics)
    inputs2 = jax.random.normal(kx2, (3, 7, input_dim), jnp.float32)
    out2 = jax.block_until_ready(fwd(inputs2, *params))
    ref2 = _reference(inputs2, *params)
    assert out2.shape == (3, 7, output_dim), out2.shape
    assert jnp.allclose(out2, ref2, atol=2e-3, rtol=2e-3), \
        float(jnp.max(jnp.abs(out2 - ref2)))

    print("KERNEL_OK")
</pallas_src>

<mosaic_0001>
module attributes {stable_mosaic.version = 11 : i64} {
  func.func @_fwd_stats_kernel(%arg0: i32, %arg1: memref<16x128xf32, #tpu.memory_space<vmem>>, %arg2: memref<128x128xbf16, #tpu.memory_space<vmem>>, %arg3: memref<1x128xf32, #tpu.memory_space<vmem>>, %arg4: memref<128x128xbf16, #tpu.memory_space<vmem>>, %arg5: memref<1x128xf32, #tpu.memory_space<vmem>>, %arg6: memref<16x128xf32, #tpu.memory_space<vmem>>, %arg7: memref<1x1x128xf32, #tpu.memory_space<vmem>>, %arg8: memref<1x1x128xf32, #tpu.memory_space<vmem>>) attributes {dimension_semantics = [#tpu.dimension_semantics<parallel>], iteration_bounds = array<i64: 1>, scalar_prefetch = 0 : i64, scratch_operands = 0 : i64, tpu.core_type = #tpu.core_type<tc>, window_params = [{transform_indices = @transform_0, window_bounds = array<i64: 16, 128>}, {pipeline_mode = #tpu.pipeline_mode<synchronous>, transform_indices = @transform_1, window_bounds = array<i64: 128, 128>}, {pipeline_mode = #tpu.pipeline_mode<synchronous>, transform_indices = @transform_2, window_bounds = array<i64: 1, 128>}, {pipeline_mode = #tpu.pipeline_mode<synchronous>, transform_indices = @transform_3, window_bounds = array<i64: 128, 128>}, {pipeline_mode = #tpu.pipeline_mode<synchronous>, transform_indices = @transform_4, window_bounds = array<i64: 1, 128>}, {transform_indices = @transform_5, window_bounds = array<i64: 16, 128>}, {transform_indices = @transform_6, window_bounds = array<i64: 1, 1, 128>}, {transform_indices = @transform_7, window_bounds = array<i64: 1, 1, 128>}]} {
    %c0 = arith.constant 0 : index
    %c0_0 = arith.constant 0 : index
    %0 = vector.load %arg1[%c0, %c0_0] : memref<16x128xf32, #tpu.memory_space<vmem>>, vector<16x128xf32>
    %1 = arith.truncf %0 : vector<16x128xf32> to vector<16x128xbf16>
    %c0_1 = arith.constant 0 : index
    %c0_2 = arith.constant 0 : index
    %2 = vector.load %arg2[%c0_1, %c0_2] : memref<128x128xbf16, #tpu.memory_space<vmem>>, vector<128x128xbf16>
    %cst = arith.constant dense<0.000000e+00> : vector<16x128xf32>
    %3 = tpu.matmul %1, %2, %cst {dimension_numbers = #tpu.dot_dimension_numbers<[1], [0], [0], [1], [0, 0, 1, 1], [], []>} : vector<16x128xbf16>, vector<128x128xbf16>, vector<16x128xf32> -> vector<16x128xf32>
    %c0_3 = arith.constant 0 : index
    %c0_4 = arith.constant 0 : index
    %4 = vector.load %arg3[%c0_3, %c0_4] : memref<1x128xf32, #tpu.memory_space<vmem>>, vector<1x128xf32>
    %5 = vector.broadcast %4 : vector<1x128xf32> to vector<16x128xf32>
    %6 = arith.addf %3, %5 : vector<16x128xf32>
    %cst_5 = arith.constant 0.000000e+00 : f32
    %7 = vector.broadcast %cst_5 : f32 to vector<16x128xf32>
    %8 = arith.maximumf %6, %7 : vector<16x128xf32>
    %9 = arith.truncf %8 : vector<16x128xf32> to vector<16x128xbf16>
    %c0_6 = arith.constant 0 : index
    %c0_7 = arith.constant 0 : index
    %10 = vector.load %arg4[%c0_6, %c0_7] : memref<128x128xbf16, #tpu.memory_space<vmem>>, vector<128x128xbf16>
    %cst_8 = arith.constant dense<0.000000e+00> : vector<16x128xf32>
    %11 = tpu.matmul %9, %10, %cst_8 {dimension_numbers = #tpu.dot_dimension_numbers<[1], [0], [0], [1], [0, 0, 1, 1], [], []>} : vector<16x128xbf16>, vector<128x128xbf16>, vector<16x128xf32> -> vector<16x128xf32>
    %c0_9 = arith.constant 0 : index
    %c0_10 = arith.constant 0 : index
    %12 = vector.load %arg5[%c0_9, %c0_10] : memref<1x128xf32, #tpu.memory_space<vmem>>, vector<1x128xf32>
    %13 = vector.broadcast %12 : vector<1x128xf32> to vector<16x128xf32>
    %14 = arith.addf %11, %13 : vector<16x128xf32>
    %cst_11 = arith.constant 0.000000e+00 : f32
    %15 = vector.broadcast %cst_11 : f32 to vector<16x128xf32>
    %16 = arith.maximumf %14, %15 : vector<16x128xf32>
    %c0_12 = arith.constant 0 : index
    %c0_13 = arith.constant 0 : index
    %17 = vector.load %arg6[%c0_12, %c0_13] : memref<16x128xf32, #tpu.memory_space<vmem>>, vector<16x128xf32>
    tpu.vector_store %arg6[%c0_12, %c0_13], %16 {strides = array<i32>} : memref<16x128xf32, #tpu.memory_space<vmem>>, vector<16x128xf32>,
    %cst_14 = arith.constant dense<0.000000e+00> : vector<128xf32>
    %18 = vector.multi_reduction <add>, %16, %cst_14 [0] : vector<16x128xf32> to vector<128xf32>
    %19 = vector.shape_cast %18 : vector<128xf32> to vector<1x128xf32>
    %20 = arith.mulf %16, %16 : vector<16x128xf32>
    %cst_15 = arith.constant dense<0.000000e+00> : vector<128xf32>
    %21 = vector.multi_reduction <add>, %20, %cst_15 [0] : vector<16x128xf32> to vector<128xf32>
    %22 = vector.shape_cast %21 : vector<128xf32> to vector<1x128xf32>
    %23 = vector.shape_cast %19 : vector<1x128xf32> to vector<1x1x128xf32>
    %c0_16 = arith.constant 0 : index
    %c0_17 = arith.constant 0 : index
    %c0_18 = arith.constant 0 : index
    %24 = vector.load %arg7[%c0_16, %c0_17, %c0_18] : memref<1x1x128xf32, #tpu.memory_space<vmem>>, vector<1x1x128xf32>
    tpu.vector_store %arg7[%c0_16, %c0_17, %c0_18], %23 {strides = array<i32>} : memref<1x1x128xf32, #tpu.memory_space<vmem>>, vector<1x1x128xf32>,
    %25 = vector.shape_cast %22 : vector<1x128xf32> to vector<1x1x128xf32>
    %c0_19 = arith.constant 0 : index
    %c0_20 = arith.constant 0 : index
    %c0_21 = arith.constant 0 : index
    %26 = vector.load %arg8[%c0_19, %c0_20, %c0_21] : memref<1x1x128xf32, #tpu.memory_space<vmem>>, vector<1x1x128xf32>
    tpu.vector_store %arg8[%c0_19, %c0_20, %c0_21], %25 {strides = array<i32>} : memref<1x1x128xf32, #tpu.memory_space<vmem>>, vector<1x1x128xf32>,
    return
  }
  func.func @transform_0(%arg0: i32) -> (i32, i32) {
    %c0_i32 = arith.constant 0 : i32
    %c0_i32_0 = arith.constant 0 : i32
    return %arg0, %c0_i32 : i32, i32
  }
  func.func @transform_1(%arg0: i32) -> (i32, i32) {
    %c0_i32 = arith.constant 0 : i32
    %c0_i32_0 = arith.constant 0 : i32
    %c0_i32_1 = arith.constant 0 : i32
    return %c0_i32, %c0_i32_0 : i32, i32
  }
  func.func @transform_2(%arg0: i32) -> (i32, i32) {
    %c0_i32 = arith.constant 0 : i32
    %c0_i32_0 = arith.constant 0 : i32
    %c0_i32_1 = arith.constant 0 : i32
    return %c0_i32, %c0_i32_0 : i32, i32
  }
  func.func @transform_3(%arg0: i32) -> (i32, i32) {
    %c0_i32 = arith.constant 0 : i32
    %c0_i32_0 = arith.constant 0 : i32
    %c0_i32_1 = arith.constant 0 : i32
    return %c0_i32, %c0_i32_0 : i32, i32
  }
  func.func @transform_4(%arg0: i32) -> (i32, i32) {
    %c0_i32 = arith.constant 0 : i32
    %c0_i32_0 = arith.constant 0 : i32
    %c0_i32_1 = arith.constant 0 : i32
    return %c0_i32, %c0_i32_0 : i32, i32
  }
  func.func @transform_5(%arg0: i32) -> (i32, i32) {
    %c0_i32 = arith.constant 0 : i32
    %c0_i32_0 = arith.constant 0 : i32
    return %arg0, %c0_i32 : i32, i32
  }
  func.func @transform_6(%arg0: i32) -> (i32, i32, i32) {
    %c0_i32 = arith.constant 0 : i32
    %c0_i32_0 = arith.constant 0 : i32
    %c0_i32_1 = arith.constant 0 : i32
    return %arg0, %c0_i32, %c0_i32_0 : i32, i32, i32
  }
  func.func @transform_7(%arg0: i32) -> (i32, i32, i32) {
    %c0_i32 = arith.constant 0 : i32
    %c0_i32_0 = arith.constant 0 : i32
    %c0_i32_1 = arith.constant 0 : i32
    return %arg0, %c0_i32, %c0_i32_0 : i32, i32, i32
  }
}

module attributes {stable_mosaic.version = 11 : i64} {
  func.func @_norm_kernel(%arg0: i32, %arg1: memref<16x128xf32, #tpu.memory_space<vmem>>, %arg2: memref<1x128xf32, #tpu.memory_space<vmem>>, %arg3: memref<1x128xf32, #tpu.memory_space<vmem>>, %arg4: memref<16x128xf32, #tpu.memory_space<vmem>>) attributes {dimension_semantics = [#tpu.dimension_semantics<parallel>], iteration_bounds = array<i64: 1>, scalar_prefetch = 0 : i64, scratch_operands = 0 : i64, tpu.core_type = #tpu.core_type<tc>, window_params = [{transform_indices = @transform_0, window_bounds = array<i64: 16, 128>}, {pipeline_mode = #tpu.pipeline_mode<synchronous>, transform_indices = @transform_1, window_bounds = array<i64: 1, 128>}, {pipeline_mode = #tpu.pipeline_mode<synchronous>, transform_indices = @transform_2, window_bounds = array<i64: 1, 128>}, {transform_indices = @transform_3, window_bounds = array<i64: 16, 128>}]} {
    %c0 = arith.constant 0 : index
    %c0_0 = arith.constant 0 : index
    %0 = vector.load %arg1[%c0, %c0_0] : memref<16x128xf32, #tpu.memory_space<vmem>>, vector<16x128xf32>
    %c0_1 = arith.constant 0 : index
    %c0_2 = arith.constant 0 : index
    %1 = vector.load %arg2[%c0_1, %c0_2] : memref<1x128xf32, #tpu.memory_space<vmem>>, vector<1x128xf32>
    %2 = vector.broadcast %1 : vector<1x128xf32> to vector<16x128xf32>
    %3 = arith.mulf %0, %2 : vector<16x128xf32>
    %c0_3 = arith.constant 0 : index
    %c0_4 = arith.constant 0 : index
    %4 = vector.load %arg3[%c0_3, %c0_4] : memref<1x128xf32, #tpu.memory_space<vmem>>, vector<1x128xf32>
    %5 = vector.broadcast %4 : vector<1x128xf32> to vector<16x128xf32>
    %6 = arith.addf %3, %5 : vector<16x128xf32>
    %c0_5 = arith.constant 0 : index
    %c0_6 = arith.constant 0 : index
    %7 = vector.load %arg4[%c0_5, %c0_6] : memref<16x128xf32, #tpu.memory_space<vmem>>, vector<16x128xf32>
    tpu.vector_store %arg4[%c0_5, %c0_6], %6 {strides = array<i32>} : memref<16x128xf32, #tpu.memory_space<vmem>>, vector<16x128xf32>,
    return
  }
  func.func @transform_0(%arg0: i32) -> (i32, i32) {
    %c0_i32 = arith.constant 0 : i32
    %c0_i32_0 = arith.constant 0 : i32
    return %arg0, %c0_i32 : i32, i32
  }
  func.func @transform_1(%arg0: i32) -> (i32, i32) {
    %c0_i32 = arith.constant 0 : i32
    %c0_i32_0 = arith.constant 0 : i32
    %c0_i32_1 = arith.constant 0 : i32
    return %c0_i32, %c0_i32_0 : i32, i32
  }
  func.func @transform_2(%arg0: i32) -> (i32, i32) {
    %c0_i32 = arith.constant 0 : i32
    %c0_i32_0 = arith.constant 0 : i32
    %c0_i32_1 = arith.constant 0 : i32
    return %c0_i32, %c0_i32_0 : i32, i32
  }
  func.func @transform_3(%arg0: i32) -> (i32, i32) {
    %c0_i32 = arith.constant 0 : i32
    %c0_i32_0 = arith.constant 0 : i32
    return %arg0, %c0_i32 : i32, i32
  }
}

</mosaic_0001>

<bundles_post_ra>
// kernel: mlp_forward.3
= control target key start
LH: loop header
LB: loop body
LE: loop exit
PB: predicated region body
PF: predicated region fallthrough
CT: control target
= control target key end

     0   :  { %s80_s0 = inlined_call_operand.vmem [shape: f32[16,128], index: 0, kind: input, shape index: {}]   ;;  %s81_s1 = inlined_call_operand.vmem [shape: f32[1,128], index: 1, kind: input, shape index: {}]   ;;  %s82_s2 = inlined_call_operand.vmem [shape: f32[1,128], index: 2, kind: input, shape index: {}]   ;;  %s83_s3 = inlined_call_operand.vmem [shape: f32[16,128], index: 3, kind: output, shape index: {}]  }
   0x1   :  { %v14_v0 = vld [vmem:[%s80_s0] sm:$0xff]  ;;  %v15_v4 = vld [vmem:[%s80_s0 + $0x8] sm:$0xff] }
   0x2   :  { %v40_v1 = vld [vmem:[%s81_s1] ss:$0 sm:$0xff] }
   0x3   :  { %v41_v2 = vld [vmem:[%s82_s2] ss:$0 sm:$0xff]  ;;  %v23_v3 = vmul.f32 %v40_v1, %v14_v0  ;;  %v24_v5 = vmul.f32 %v40_v1, %v15_v4 }
   0x5   :  { %v32_v6 = vadd.f32 %v41_v2, %v23_v3  ;;  %v33_v7 = vadd.f32 %v41_v2, %v24_v5 }
   0x7   :  { %34 = vst [vmem:[%s83_s3] sm:$0xff] %v32_v6  ;;  %35 = vst [vmem:[%s83_s3 + $0x8] sm:$0xff] %v33_v7 }

// kernel: mlp_forward.2
= control target key start
LH: loop header
LB: loop body
LE: loop exit
PB: predicated region body
PF: predicated region fallthrough
CT: control target
= control target key end

     0   :  { %v382_v0 = vmov 0.0   ;;  %vm383_vm0 = vmmov 0   ;;  %s496_s1 = inlined_call_operand.vmem [shape: bf16[128,128], index: 1, kind: input, shape index: {}]   ;;  %s497_s3 = inlined_call_operand.vmem [shape: bf16[128,128], index: 3, kind: input, shape index: {}]   ;;  %s498_s0 = inlined_call_operand.vmem [shape: f32[16,128], index: 0, kind: input, shape index: {}]   ;;  %s499_s2 = inlined_call_operand.vmem [shape: f32[1,128], index: 2, kind: input, shape index: {}]   ;;  %s500_s4 = inlined_call_operand.vmem [shape: f32[1,128], index: 4, kind: input, shape index: {}]   ;;  %s501_s5 = inlined_call_operand.vmem [shape: f32[16,128], index: 5, kind: output, shape index: {0}]   ;;  %s502_s6 = inlined_call_operand.vmem [shape: f32[1,1,128], index: 6, kind: output, shape index: {1}]   ;;  %s503_s7 = inlined_call_operand.vmem [shape: f32[1,1,128], index: 7, kind: output, shape index: {2}]  }
   0x1   :  { %324 = vmatprep.subr.bf16.mxu0 %v382_v0  ;;  %v366_v1 = vld [vmem:[%s496_s1] sm:$0xff]   ;;  %340 = vmatprep.mubr.msk.bf16.mxu0 %vm383_vm0, %v382_v0  ;;  %v367_v2 = vld [vmem:[%s496_s1 + $0x8] sm:$0xff]   ;;  %v368_v3 = vld [vmem:[%s496_s1 + $0x10] sm:$0xff]  }
   0x2   :  { %344 = vmatprep.subr.bf16.mxu1 %v382_v0  ;;  %360 = vmatprep.mubr.msk.bf16.mxu1 %vm383_vm0, %v382_v0  ;;  %v374_v4 = vld [vmem:[%s497_s3] sm:$0xff]   ;;  %v369_v5 = vld [vmem:[%s496_s1 + $0x18] sm:$0xff]   ;;  %v375_v6 = vld [vmem:[%s497_s3 + $0x8] sm:$0xff]  }
   0x3   :  { %325 = vmatpush3.bf16.msra.mxu0 %v366_v1  ;;  %345 = vmatpush3.bf16.msra.mxu1 %v374_v4  ;;  %v370_v7 = vld [vmem:[%s496_s1 + $0x20] sm:$0xff]   ;;  %v376_v8 = vld [vmem:[%s497_s3 + $0x10] sm:$0xff]   ;;  %v371_v9 = vld [vmem:[%s496_s1 + $0x28] sm:$0xff]  }
   0x4   :  { %326 = vmatprep.subr.bf16.mxu0 %v382_v0  ;;  %346 = vmatprep.subr.bf16.mxu1 %v382_v0  ;;  %v377_v10 = vld [vmem:[%s497_s3 + $0x18] sm:$0xff]   ;;  %v372_v11 = vld [vmem:[%s496_s1 + $0x30] sm:$0xff]   ;;  %v378_v12 = vld [vmem:[%s497_s3 + $0x20] sm:$0xff]  }
   0x5   :  { %v373_v13 = vld [vmem:[%s496_s1 + $0x38] sm:$0xff]   ;;  %v24_v14 = vld [vmem:[%s498_s0] sm:$0xff]  ;;  %v25_v15 = vld [vmem:[%s498_s0 + $0x8] sm:$0xff] }
   0x6   :  { %v379_v16 = vld [vmem:[%s497_s3 + $0x28] sm:$0xff]   ;;  %v26_v17 = vpack.c.bf16 %v25_v15, %v24_v14  ;;  %v380_v18 = vld [vmem:[%s497_s3 + $0x30] sm:$0xff]   ;;  %v381_v19 = vld [vmem:[%s497_s3 + $0x38] sm:$0xff]  }
   0x7   :  { %327 = vmatpush3.bf16.msra.mxu0 %v367_v2  ;;  %347 = vmatpush3.bf16.msra.mxu1 %v375_v6  ;;  %v288_v20 = vld [vmem:[%s499_s2] ss:$0 sm:$0xff] }
   0x8   :  { %328 = vmatprep.subr.bf16.mxu0 %v382_v0  ;;  %348 = vmatprep.subr.bf16.mxu1 %v382_v0  ;;  %v297_v30 = vld [vmem:[%s500_s4] ss:$0 sm:$0xff] }
   0xb   :  { %329 = vmatpush3.bf16.msra.mxu0 %v368_v3  ;;  %349 = vmatpush3.bf16.msra.mxu1 %v376_v8 }
   0xc   :  { %330 = vmatprep.subr.bf16.mxu0 %v382_v0  ;;  %350 = vmatprep.subr.bf16.mxu1 %v382_v0 }
   0xf   :  { %331 = vmatpush3.bf16.msra.mxu0 %v369_v5  ;;  %351 = vmatpush3.bf16.msra.mxu1 %v377_v10 }
  0x10   :  { %332 = vmatprep.subr.bf16.mxu0 %v382_v0  ;;  %352 = vmatprep.subr.bf16.mxu1 %v382_v0 }
  0x13   :  { %333 = vmatpush3.bf16.msra.mxu0 %v370_v7  ;;  %353 = vmatpush3.bf16.msra.mxu1 %v378_v12 }
  0x14   :  { %334 = vmatprep.subr.bf16.mxu0 %v382_v0  ;;  %354 = vmatprep.subr.bf16.mxu1 %v382_v0 }
  0x17   :  { %335 = vmatpush3.bf16.msra.mxu0 %v371_v9  ;;  %355 = vmatpush3.bf16.msra.mxu1 %v379_v16 }
  0x18   :  { %336 = vmatprep.subr.bf16.mxu0 %v382_v0  ;;  %356 = vmatprep.subr.bf16.mxu1 %v382_v0 }
  0x1b   :  { %337 = vmatpush3.bf16.msra.mxu0 %v372_v11  ;;  %357 = vmatpush3.bf16.msra.mxu1 %v380_v18 }
  0x1c   :  { %338 = vmatprep.subr.bf16.mxu0 %v382_v0  ;;  %358 = vmatprep.subr.bf16.mxu1 %v382_v0 }
  0x1f   :  { %339 = vmatpush3.bf16.msra.mxu0 %v373_v13  ;;  %359 = vmatpush3.bf16.msra.mxu1 %v381_v19 }
  0x22   :  { %341 = vmatmul.mubr.bf16.vlgmr.msra.gmra.mrb[0].mxu0 %v26_v17 }
  0xf5   :  { %v132_v21 = vpop.f32.mrb[0].mxu0 }
  0xf6   :  { %v133_v22 = vadd.f32 %v288_v20, %v132_v21  ;;  %v342_v23 = vpop.f32.mrb[1].mxu0 }
  0xf7   :  { %v135_v24 = vpop.f32.mrb[2].mxu0 }
  0xf8   :  { %v136_v25 = vadd.f32 %v288_v20, %v135_v24  ;;  %v343_v26 = vpop.f32.mrb[3].mxu0  ;;  %v139_v27 = vmax.f32 %v133_v22, 0.0 }
  0xfa   :  { %v140_v28 = vmax.f32 %v136_v25, 0.0 }
  0xfc   :  { %v141_v29 = vpack.c.bf16 %v140_v28, %v139_v27 }
  0xfe   :  { %361 = vmatmul.mubr.bf16.vlgmr.msra.gmra.mrb[0].mxu1 %v141_v29 }
 0x1d1   :  { %v247_v31 = vpop.f32.mrb[0].mxu1 }
 0x1d2   :  { %v248_v32 = vadd.f32 %v297_v30, %v247_v31  ;;  %v362_v33 = vpop.f32.mrb[1].mxu1 }
 0x1d3   :  { %v250_v34 = vpop.f32.mrb[2].mxu1 }
 0x1d4   :  { %v254_v35 = vmax.f32 %v248_v32, 0.0  ;;  %v251_v36 = vadd.f32 %v297_v30, %v250_v34  ;;  %v363_v37 = vpop.f32.mrb[3].mxu1 }
 0x1d6   :  { %256 = vst [vmem:[%s501_s5] sm:$0xff] %v254_v35  ;;  %v255_v38 = vmax.f32 %v251_v36, 0.0  ;;  %v265_v39 = vmul.f32 %v254_v35, %v254_v35 }
 0x1d8   :  { %257 = vst [vmem:[%s501_s5 + $0x8] sm:$0xff] %v255_v38  ;;  %v258_v40 = vadd.f32 %v255_v38, %v254_v35  ;;  %v266_v41 = vmul.f32 %v255_v38, %v255_v38 }
 0x1da   :  { %v259_v42 = vrot.slane %v258_v40, 4  ;;  %v267_v43 = vadd.f32 %v266_v41, %v265_v39 }
 0x1dc   :  { %v260_v44 = vadd.f32 %v259_v42, %v258_v40  ;;  %v268_v45 = vrot.slane %v267_v43, 4 }
 0x1de   :  { %v261_v46 = vrot.slane %v260_v44, 2  ;;  %v269_v47 = vadd.f32 %v268_v45, %v267_v43 }
 0x1e0   :  { %v262_v48 = vadd.f32 %v261_v46, %v260_v44  ;;  %v270_v49 = vrot.slane %v269_v47, 2 }
 0x1e2   :  { %v263_v50 = vrot.slane %v262_v48, 1  ;;  %v271_v51 = vadd.f32 %v270_v49, %v269_v47 }
 0x1e4   :  { %v264_v52 = vadd.f32 %v263_v50, %v262_v48  ;;  %v272_v53 = vrot.slane %v271_v51, 1 }
 0x1e6   :  { %v273_v54 = vadd.f32 %v272_v53, %v271_v51  ;;  %274 = vst [vmem:[%s502_s6] sm:$0x1] %v264_v52 }
 0x1e8   :  { %275 = vst [vmem:[%s503_s7] sm:$0x1] %v273_v54 }

</bundles_post_ra>
